<compile_context>
chip_gen: v7x
topology: tpu7x:2x2x1
jax: 0.10.0
libtpu: 0.0.40
codegen_flags: <defaults>
</compile_context>

<pallas_src>
import functools

import jax
import jax.numpy as jnp
from jax.experimental import pallas as pl
from jax.experimental.pallas import tpu as pltpu


# Explicit scoped-VMEM limit: headroom on v7x (64 MiB physical), above the
# 16 MiB default scope on v5e, comfortable on v6e.
_VMEM_LIMIT_BYTES = 48 * 1024 * 1024
# Per-block byte budget (double-buffered in+out in the apply kernel => ~4x).
_BLOCK_BUDGET_BYTES = 2 * 1024 * 1024


# ----------------------------------------------------------------------------
# Byte-budgeted tile selection for a (B*C, S) array.
# Row tile must divide B*C and be a multiple of 8 (or == B*C); spatial tile
# must divide S and be a multiple of 128 (or == S)  [Mosaic (8,128) rule].
# ----------------------------------------------------------------------------
def _divisor_tile(n, quantum, cap):
    if n <= cap:
        return n
    t = (cap // quantum) * quantum
    while t >= quantum:
        if n % t == 0:
            return t
        t -= quantum
    # TODO(synk): no aligned divisor <= cap exists; fall back to the full
    # extent (valid block, may exceed the byte budget for awkward sizes).
    return n


def _pick_tiles(BC, S, itemsize, budget_bytes=_BLOCK_BUDGET_BYTES):
    budget = max(8 * 128, budget_bytes // itemsize)   # budget in elements
    ts = _divisor_tile(S, 128, budget)                # lane-dense spatial tile
    if BC > 8 and budget // ts < 8:
        # Leave room for at least an 8-row block.
        ts = _divisor_tile(S, 128, max(128, budget // 8))
    rows = _divisor_tile(BC, 8, max(8, budget // ts))
    return rows, ts


# ----------------------------------------------------------------------------
# Kernel 1: fused global average + max pooling over the flattened spatial axis
#   x:   (B*C, S) native dtype, tiled as (rows, ts)
#   out: avg (B*C, 1) f32, max (B*C, 1) f32
#   scratch: running f32 sum / max, (rows, 1) each
# ----------------------------------------------------------------------------
def _ca_pool_kernel(x_ref, avg_ref, max_ref, sum_sc, max_sc, *, inv_s):
    s = pl.program_id(1)

    @pl.when(s == 0)
    def _():
        sum_sc[...] = jnp.zeros_like(sum_sc)
        max_sc[...] = jnp.full_like(max_sc, -jnp.inf)

    x = x_ref[...]                                           # (rows, ts), x.dtype
    sum_sc[...] += jnp.sum(x.astype(jnp.float32), axis=1, keepdims=True)
    max_sc[...] = jnp.maximum(
        max_sc[...], jnp.max(x, axis=1, keepdims=True).astype(jnp.float32))

    @pl.when(s == pl.num_programs(1) - 1)
    def _():
        avg_ref[...] = sum_sc[...] * inv_s
        max_ref[...] = max_sc[...]


def ca_pool(xf, rows, ts):
    """xf: (B*C, S) in native dtype -> avg (B*C,), max (B*C,) in float32."""
    BC, S = xf.shape
    grid = (BC // rows, S // ts)
    kernel = functools.partial(_ca_pool_kernel, inv_s=float(1.0 / S))
    avg, mx = pl.pallas_call(
        kernel,
        out_shape=(jax.ShapeDtypeStruct((BC, 1), jnp.float32),
                   jax.ShapeDtypeStruct((BC, 1), jnp.float32)),
        grid=grid,
        in_specs=[pl.BlockSpec((rows, ts), lambda r, s: (r, s))],
        out_specs=(pl.BlockSpec((rows, 1), lambda r, s: (r, 0)),
                   pl.BlockSpec((rows, 1), lambda r, s: (r, 0))),
        scratch_shapes=[pltpu.VMEM((rows, 1), jnp.float32),
                        pltpu.VMEM((rows, 1), jnp.float32)],
        compiler_params=pltpu.CompilerParams(
            dimension_semantics=("parallel", "arbitrary"),
            vmem_limit_bytes=_VMEM_LIMIT_BYTES),
    )(xf)
    return avg[:, 0], mx[:, 0]


# ----------------------------------------------------------------------------
# Kernel 2: apply per-channel attention (broadcast multiply), native dtype
# ----------------------------------------------------------------------------
def _ca_apply_kernel(x_ref, att_ref, o_ref):
    o_ref[...] = att_ref[...] * x_ref[...]                   # (rows,1)*(rows,ts)


def ca_apply(xf, att2, rows, ts):
    """xf: (B*C, S); att2: (B*C, 1), both in x.dtype -> (B*C, S) in x.dtype."""
    BC, S = xf.shape
    grid = (BC // rows, S // ts)
    return pl.pallas_call(
        _ca_apply_kernel,
        out_shape=jax.ShapeDtypeStruct((BC, S), xf.dtype),
        grid=grid,
        in_specs=[pl.BlockSpec((rows, ts), lambda r, s: (r, s)),
                  pl.BlockSpec((rows, 1), lambda r, s: (r, 0))],
        out_specs=pl.BlockSpec((rows, ts), lambda r, s: (r, s)),
        compiler_params=pltpu.CompilerParams(
            dimension_semantics=("parallel", "parallel"),
            vmem_limit_bytes=_VMEM_LIMIT_BYTES),
    )(xf, att2)


# ----------------------------------------------------------------------------
# Tiny FC (Linear -> exact-erf GELU -> Linear -> Sigmoid), plain JAX glue, f32
# ----------------------------------------------------------------------------
def _fc(v, p):
    v = v.astype(jnp.float32)
    h = v @ p["w1"].T + p["b1"]
    h = jax.nn.gelu(h, approximate=False)      # exact erf, matches nn.GELU()
    o = h @ p["w2"].T + p["b2"]
    return jax.nn.sigmoid(o)


# ----------------------------------------------------------------------------
# Full ChannelAttention3D forward
# ----------------------------------------------------------------------------
def channel_attention_3d(x, params):
    B, C, D, H, W = x.shape
    S = D * H * W
    BC = B * C
    xf = x.reshape(BC, S)                                  # native dtype, lane-dense
    rows, ts = _pick_tiles(BC, S, jnp.dtype(x.dtype).itemsize)

    avg, mx = ca_pool(xf, rows, ts)                        # (BC,) f32 each
    avg = avg.reshape(B, C)
    mx = mx.reshape(B, C)

    # Batch the two FC evaluations into a single pass.
    both = _fc(jnp.concatenate([avg, mx], axis=0), params)  # (2B, C) f32
    att = (both[:B] + both[B:]).astype(x.dtype)             # (B, C) in x.dtype

    out = ca_apply(xf, att.reshape(BC, 1), rows, ts)         # (BC, S) in x.dtype
    return out.reshape(B, C, D, H, W)


# ----------------------------------------------------------------------------
# Pure-JAX reference (for correctness checking)
# ----------------------------------------------------------------------------
def _reference(x, params):
    B, C = x.shape[:2]
    xf = x.astype(jnp.float32)
    avg = jnp.mean(xf, axis=(2, 3, 4))
    mx = jnp.max(xf, axis=(2, 3, 4))
    att = _fc(avg, params) + _fc(mx, params)
    return att.reshape(B, C, 1, 1, 1) * xf


def init_params(key, C, reduction=4):
    h = C // reduction
    k1, k2, k3, k4 = jax.random.split(key, 4)
    return dict(
        w1=(1.0 / jnp.sqrt(C)) * jax.random.normal(k1, (h, C), jnp.float32),
        b1=0.1 * jax.random.normal(k2, (h,), jnp.float32),
        w2=(1.0 / jnp.sqrt(h)) * jax.random.normal(k3, (C, h), jnp.float32),
        b2=0.1 * jax.random.normal(k4, (C,), jnp.float32),
    )


if __name__ == "__main__":
    key = jax.random.PRNGKey(0)
    kx, kp = jax.random.split(key)

    B, C, D, H, W = 2, 16, 8, 16, 16          # reduction=4 -> hidden 4
    x = jax.random.normal(kx, (B, C, D, H, W), jnp.float32)
    params = init_params(kp, C)

    fwd = jax.jit(channel_attention_3d)

    # float32 path: exact correctness check against pure-JAX reference.
    out = jax.block_until_ready(fwd(x, params))
    assert out.shape == (B, C, D, H, W), out.shape
    assert out.dtype == x.dtype, out.dtype
    assert bool(jnp.all(jnp.isfinite(out)))
    ref = _reference(x, params)
    max_err = float(jnp.max(jnp.abs(out - ref)))
    assert max_err < 1e-4, f"f32 max abs error {max_err}"

    # bfloat16 path: native-dtype streaming, output stays bf16.
    x_bf16 = x.astype(jnp.bfloat16)
    out_bf16 = jax.block_until_ready(fwd(x_bf16, params))
    assert out_bf16.dtype == jnp.bfloat16, out_bf16.dtype
    assert bool(jnp.all(jnp.isfinite(out_bf16.astype(jnp.float32))))
    ref_bf16 = _reference(x_bf16, params)
    max_err_bf16 = float(jnp.max(jnp.abs(out_bf16.astype(jnp.float32) - ref_bf16)))
    assert max_err_bf16 < 0.25, f"bf16 max abs error {max_err_bf16}"

    print("KERNEL_OK")
</pallas_src>

<mosaic_0001>
module attributes {stable_mosaic.version = 11 : i64} {
  func.func @_ca_pool_kernel(%arg0: i32, %arg1: i32, %arg2: memref<32x2048xf32, #tpu.memory_space<vmem>>, %arg3: memref<32x1xf32, #tpu.memory_space<vmem>>, %arg4: memref<32x1xf32, #tpu.memory_space<vmem>>, %arg5: memref<32x1xf32, #tpu.memory_space<vmem>>, %arg6: memref<32x1xf32, #tpu.memory_space<vmem>>) attributes {dimension_semantics = [#tpu.dimension_semantics<parallel>, #tpu.dimension_semantics<arbitrary>], iteration_bounds = array<i64: 1, 1>, scalar_prefetch = 0 : i64, scratch_operands = 2 : i64, tpu.core_type = #tpu.core_type<tc>, window_params = [{transform_indices = @transform_0, window_bounds = array<i64: 32, 2048>}, {transform_indices = @transform_1, window_bounds = array<i64: 32, 1>}, {transform_indices = @transform_2, window_bounds = array<i64: 32, 1>}]} {
    %c0_i32 = arith.constant 0 : i32
    %0 = arith.cmpi eq, %arg1, %c0_i32 : i32
    %1 = arith.extui %0 : i1 to i32
    %c0_i32_0 = arith.constant 0 : i32
    %2 = arith.cmpi ne, %1, %c0_i32_0 : i32
    scf.if %2 {
      %cst_13 = arith.constant 0.000000e+00 : f32
      %17 = vector.broadcast %cst_13 : f32 to vector<32x1xf32>
      %c0_14 = arith.constant 0 : index
      %c0_15 = arith.constant 0 : index
      %18 = vector.load %arg5[%c0_14, %c0_15] : memref<32x1xf32, #tpu.memory_space<vmem>>, vector<32x1xf32>
      tpu.vector_store %arg5[%c0_14, %c0_15], %17 {strides = array<i32>} : memref<32x1xf32, #tpu.memory_space<vmem>>, vector<32x1xf32>,
      %cst_16 = arith.constant 0xFF800000 : f32
      %19 = vector.broadcast %cst_16 : f32 to vector<32x1xf32>
      %c0_17 = arith.constant 0 : index
      %c0_18 = arith.constant 0 : index
      %20 = vector.load %arg6[%c0_17, %c0_18] : memref<32x1xf32, #tpu.memory_space<vmem>>, vector<32x1xf32>
      tpu.vector_store %arg6[%c0_17, %c0_18], %19 {strides = array<i32>} : memref<32x1xf32, #tpu.memory_space<vmem>>, vector<32x1xf32>,
    } else {
    }
    %c0 = arith.constant 0 : index
    %c0_1 = arith.constant 0 : index
    %3 = vector.load %arg2[%c0, %c0_1] : memref<32x2048xf32, #tpu.memory_space<vmem>>, vector<32x2048xf32>
    %c0_2 = arith.constant 0 : index
    %c0_3 = arith.constant 0 : index
    %4 = vector.load %arg5[%c0_2, %c0_3] : memref<32x1xf32, #tpu.memory_space<vmem>>, vector<32x1xf32>
    %cst = arith.constant dense<0.000000e+00> : vector<32xf32>
    %5 = vector.multi_reduction <add>, %3, %cst [1] : vector<32x2048xf32> to vector<32xf32>
    %6 = vector.shape_cast %5 : vector<32xf32> to vector<32x1xf32>
    %7 = arith.addf %4, %6 : vector<32x1xf32>
    %c0_4 = arith.constant 0 : index
    %c0_5 = arith.constant 0 : index
    %8 = vector.load %arg5[%c0_4, %c0_5] : memref<32x1xf32, #tpu.memory_space<vmem>>, vector<32x1xf32>
    tpu.vector_store %arg5[%c0_4, %c0_5], %7 {strides = array<i32>} : memref<32x1xf32, #tpu.memory_space<vmem>>, vector<32x1xf32>,
    %c0_6 = arith.constant 0 : index
    %c0_7 = arith.constant 0 : index
    %9 = vector.load %arg6[%c0_6, %c0_7] : memref<32x1xf32, #tpu.memory_space<vmem>>, vector<32x1xf32>
    %cst_8 = arith.constant dense<0xFF800000> : vector<32xf32>
    %10 = vector.multi_reduction <maximumf>, %3, %cst_8 [1] : vector<32x2048xf32> to vector<32xf32>
    %11 = vector.shape_cast %10 : vector<32xf32> to vector<32x1xf32>
    %12 = arith.maximumf %9, %11 : vector<32x1xf32>
    %c0_9 = arith.constant 0 : index
    %c0_10 = arith.constant 0 : index
    %13 = vector.load %arg6[%c0_9, %c0_10] : memref<32x1xf32, #tpu.memory_space<vmem>>, vector<32x1xf32>
    tpu.vector_store %arg6[%c0_9, %c0_10], %12 {strides = array<i32>} : memref<32x1xf32, #tpu.memory_space<vmem>>, vector<32x1xf32>,
    %c0_i32_11 = arith.constant 0 : i32
    %14 = arith.cmpi eq, %arg1, %c0_i32_11 : i32
    %15 = arith.extui %14 : i1 to i32
    %c0_i32_12 = arith.constant 0 : i32
    %16 = arith.cmpi ne, %15, %c0_i32_12 : i32
    scf.if %16 {
      %c0_13 = arith.constant 0 : index
      %c0_14 = arith.constant 0 : index
      %17 = vector.load %arg5[%c0_13, %c0_14] : memref<32x1xf32, #tpu.memory_space<vmem>>, vector<32x1xf32>
      %cst_15 = arith.constant 4.8828125E-4 : f32
      %18 = vector.broadcast %cst_15 : f32 to vector<32x1xf32>
      %19 = arith.mulf %17, %18 : vector<32x1xf32>
      %c0_16 = arith.constant 0 : index
      %c0_17 = arith.constant 0 : index
      %20 = vector.load %arg3[%c0_16, %c0_17] : memref<32x1xf32, #tpu.memory_space<vmem>>, vector<32x1xf32>
      tpu.vector_store %arg3[%c0_16, %c0_17], %19 {strides = array<i32>} : memref<32x1xf32, #tpu.memory_space<vmem>>, vector<32x1xf32>,
      %c0_18 = arith.constant 0 : index
      %c0_19 = arith.constant 0 : index
      %21 = vector.load %arg6[%c0_18, %c0_19] : memref<32x1xf32, #tpu.memory_space<vmem>>, vector<32x1xf32>
      %c0_20 = arith.constant 0 : index
      %c0_21 = arith.constant 0 : index
      %22 = vector.load %arg4[%c0_20, %c0_21] : memref<32x1xf32, #tpu.memory_space<vmem>>, vector<32x1xf32>
      tpu.vector_store %arg4[%c0_20, %c0_21], %21 {strides = array<i32>} : memref<32x1xf32, #tpu.memory_space<vmem>>, vector<32x1xf32>,
    } else {
    }
    return
  }
  func.func @transform_0(%arg0: i32, %arg1: i32) -> (i32, i32) {
    %c0_i32 = arith.constant 0 : i32
    return %arg0, %arg1 : i32, i32
  }
  func.func @transform_1(%arg0: i32, %arg1: i32) -> (i32, i32) {
    %c0_i32 = arith.constant 0 : i32
    %c0_i32_0 = arith.constant 0 : i32
    return %arg0, %c0_i32 : i32, i32
  }
  func.func @transform_2(%arg0: i32, %arg1: i32) -> (i32, i32) {
    %c0_i32 = arith.constant 0 : i32
    %c0_i32_0 = arith.constant 0 : i32
    return %arg0, %c0_i32 : i32, i32
  }
}

module attributes {stable_mosaic.version = 11 : i64} {
  func.func @_ca_apply_kernel(%arg0: i32, %arg1: i32, %arg2: memref<32x2048xf32, #tpu.memory_space<vmem>>, %arg3: memref<32x1xf32, #tpu.memory_space<vmem>>, %arg4: memref<32x2048xf32, #tpu.memory_space<vmem>>) attributes {dimension_semantics = [#tpu.dimension_semantics<parallel>, #tpu.dimension_semantics<parallel>], iteration_bounds = array<i64: 1, 1>, scalar_prefetch = 0 : i64, scratch_operands = 0 : i64, tpu.core_type = #tpu.core_type<tc>, window_params = [{transform_indices = @transform_0, window_bounds = array<i64: 32, 2048>}, {transform_indices = @transform_1, window_bounds = array<i64: 32, 1>}, {transform_indices = @transform_2, window_bounds = array<i64: 32, 2048>}]} {
    %c0 = arith.constant 0 : index
    %c0_0 = arith.constant 0 : index
    %0 = vector.load %arg3[%c0, %c0_0] : memref<32x1xf32, #tpu.memory_space<vmem>>, vector<32x1xf32>
    %c0_1 = arith.constant 0 : index
    %c0_2 = arith.constant 0 : index
    %1 = vector.load %arg2[%c0_1, %c0_2] : memref<32x2048xf32, #tpu.memory_space<vmem>>, vector<32x2048xf32>
    %2 = vector.broadcast %0 : vector<32x1xf32> to vector<32x2048xf32>
    %3 = arith.mulf %2, %1 : vector<32x2048xf32>
    %c0_3 = arith.constant 0 : index
    %c0_4 = arith.constant 0 : index
    %4 = vector.load %arg4[%c0_3, %c0_4] : memref<32x2048xf32, #tpu.memory_space<vmem>>, vector<32x2048xf32>
    tpu.vector_store %arg4[%c0_3, %c0_4], %3 {strides = array<i32>} : memref<32x2048xf32, #tpu.memory_space<vmem>>, vector<32x2048xf32>,
    return
  }
  func.func @transform_0(%arg0: i32, %arg1: i32) -> (i32, i32) {
    %c0_i32 = arith.constant 0 : i32
    return %arg0, %arg1 : i32, i32
  }
  func.func @transform_1(%arg0: i32, %arg1: i32) -> (i32, i32) {
    %c0_i32 = arith.constant 0 : i32
    %c0_i32_0 = arith.constant 0 : i32
    return %arg0, %c0_i32 : i32, i32
  }
  func.func @transform_2(%arg0: i32, %arg1: i32) -> (i32, i32) {
    %c0_i32 = arith.constant 0 : i32
    return %arg0, %arg1 : i32, i32
  }
}

</mosaic_0001>

<bundles_post_ra>
// kernel: squeeze.3
= control target key start
LH: loop header
LB: loop body
LE: loop exit
PB: predicated region body
PF: predicated region fallthrough
CT: control target
= control target key end

     0   :  { %vm19_vm0 = vcmask 130048   ;;  %v38_v6 = vmov 0.0   ;;  %s55_s0 = inlined_call_operand.vmem [shape: bf16[32], index: 0, kind: input, shape index: {}]   ;;  %s56_s1 = inlined_call_operand.vmem [shape: bf16[2,16], index: 1, kind: output, shape index: {}]  }
   0x1   :  { %v14_v0 = vld [vmem:[%s55_s0] sm:$0x1]  ;;  %s37_s0 = smov 112  }
   0x2   :  { %v15_v1 = vunpack.c.l.bf16 %v14_v0 }
   0x4   :  { %17 = vst [vmem:[#allocation1] sm:$0x3] %v15_v1 }
   0xb   :  { %v21_v2 = vld [vmem:[#allocation1] sm:$0x1]  }
   0xc   :  { %v18_v3 = vld [vmem:[#allocation1] sm:$0x1]   ;;  %22 = vrot.lane.b32.xlu0 %v21_v2, %s37_s0 }
   0xd   :  { %20 = vst.msk [vmem:[#allocation0] sm:$0x1] %vm19_vm0, %v18_v3  }
  0x7e   :  { %v23_v4 = vpop.permute.xlu0 %22  }
  0x7f   :  { %26 = vst.msk [vmem:[#allocation0 + $0x1] sm:$0x1] %vm19_vm0, %v23_v4  }
  0x86   :  { %v31_v5 = vld [vmem:[#allocation0] sm:$0x3] }
  0x87   :  { %v32_v7 = vpack.c.bf16 %v38_v6, %v31_v5 }
  0x89   :  { %34 = vst [vmem:[%s56_s1] sm:$0x1] %v32_v7 }

// kernel: channel_attention_3d.2
= control target key start
LH: loop header
LB: loop body
LE: loop exit
PB: predicated region body
PF: predicated region fallthrough
CT: control target
= control target key end

     0   :  { %vm14_vm0 = vcmask 7168   ;;  %v281_v3 = vmov 0.0   ;;  %s586_s0 = inlined_call_operand.vmem [shape: f32[32,2048], index: 0, kind: input, shape index: {}]   ;;  %s587_s1 = inlined_call_operand.vmem [shape: f32[32,1], index: 1, kind: output, shape index: {0}]   ;;  %s588_s2 = inlined_call_operand.vmem [shape: f32[32,1], index: 2, kind: output, shape index: {1}]  }
   0x1   :  { %v301_v0 = vld [vmem:[%s586_s0 + $0x100] sm:$0xff]  ;;  %v306_v1 = vld [vmem:[%s586_s0 + $0x108] sm:$0xff]  ;;  %v57_v2 = vld [vmem:[%s586_s0 + $0x110] sm:$0xff]  ;;  %17 = vst.msk [vmem:[#allocation2 + $0x10] sm:$0xff] %vm14_vm0, %v281_v3 }
   0x2   :  { %15 = vst.msk [vmem:[#allocation2] sm:$0xff] %vm14_vm0, %v281_v3  ;;  %16 = vst.msk [vmem:[#allocation2 + $0x8] sm:$0xff] %vm14_vm0, %v281_v3  ;;  %v58_v4 = vld [vmem:[%s586_s0 + $0x118] sm:$0xff]  ;;  %v125_v5 = vadd.f32 %v306_v1, %v301_v0  ;;  %v59_v7 = vld [vmem:[%s586_s0 + $0x120] sm:$0xff] }
   0x3   :  { %18 = vst.msk [vmem:[#allocation2 + $0x18] sm:$0xff] %vm14_vm0, %v281_v3  ;;  %v207_v6 = vmax.f32 %v58_v4, %v57_v2  ;;  %v60_v10 = vld [vmem:[%s586_s0 + $0x128] sm:$0xff]  ;;  %v329_v12 = vld [vmem:[%s586_s0] sm:$0xff]  ;;  %v25_v15 = vld [vmem:[%s586_s0 + $0x10] sm:$0xff] }
   0x4   :  { %v126_v8 = vadd.f32 %v125_v5, %v57_v2  ;;  %v334_v13 = vld [vmem:[%s586_s0 + $0x8] sm:$0xff]  ;;  %v26_v16 = vld [vmem:[%s586_s0 + $0x18] sm:$0xff]  ;;  %v61_v20 = vld [vmem:[%s586_s0 + $0x130] sm:$0xff] }
   0x5   :  { %v208_v9 = vmax.f32 %v207_v6, %v59_v7  ;;  %v91_v17 = vadd.f32 %v334_v13, %v329_v12  ;;  %v173_v19 = vmax.f32 %v26_v16, %v25_v15  ;;  %v27_v21 = vld [vmem:[%s586_s0 + $0x20] sm:$0xff]  ;;  %v62_v26 = vld [vmem:[%s586_s0 + $0x138] sm:$0xff]  ;;  %v28_v27 = vld [vmem:[%s586_s0 + $0x28] sm:$0xff] }
   0x6   :  { %v127_v11 = vadd.f32 %v126_v8, %v58_v4  ;;  %v359_v29 = vld [vmem:[%s586_s0 + $0x180] sm:$0xff]  ;;  %v364_v32 = vld [vmem:[%s586_s0 + $0x188] sm:$0xff]  ;;  %v73_v33 = vld [vmem:[%s586_s0 + $0x190] sm:$0xff] }
   0x7   :  { %v209_v14 = vmax.f32 %v208_v9, %v60_v10  ;;  %v92_v22 = vadd.f32 %v91_v17, %v25_v15  ;;  %v174_v24 = vmax.f32 %v173_v19, %v27_v21  ;;  %v74_v34 = vld [vmem:[%s586_s0 + $0x198] sm:$0xff]  ;;  %v63_v35 = vld [vmem:[%s586_s0 + $0x140] sm:$0xff]  ;;  %v29_v36 = vld [vmem:[%s586_s0 + $0x30] sm:$0xff]  ;;  %v142_v39 = vadd.f32 %v364_v32, %v359_v29 }
   0x8   :  { %v128_v18 = vadd.f32 %v127_v11, %v59_v7  ;;  %v224_v38 = vmax.f32 %v74_v34, %v73_v33  ;;  %v75_v42 = vld [vmem:[%s586_s0 + $0x1a0] sm:$0xff]  ;;  %v386_v44 = vld [vmem:[%s586_s0 + $0x148] sm:$0xff]  ;;  %v30_v45 = vld [vmem:[%s586_s0 + $0x38] sm:$0xff] }
   0x9   :  { %v210_v25 = vmax.f32 %v209_v14, %v61_v20  ;;  %v93_v28 = vadd.f32 %v92_v22, %v26_v16  ;;  %v175_v31 = vmax.f32 %v174_v24, %v28_v27  ;;  %v143_v48 = vadd.f32 %v142_v39, %v73_v33  ;;  %v65_v49 = vld [vmem:[%s586_s0 + $0x150] sm:$0xff]  ;;  %v31_v52 = vld [vmem:[%s586_s0 + $0x40] sm:$0xff]  ;;  %v76_v53 = vld [vmem:[%s586_s0 + $0x1a8] sm:$0xff] }
   0xa   :  { %v129_v23 = vadd.f32 %v128_v18, %v60_v10  ;;  %v225_v47 = vmax.f32 %v224_v38, %v75_v42  ;;  %v39_v57 = vld [vmem:[%s586_s0 + $0x80] sm:$0xff]  ;;  %v40_v58 = vld [vmem:[%s586_s0 + $0x88] sm:$0xff]  ;;  %v41_v59 = vld [vmem:[%s586_s0 + $0x90] sm:$0xff] }
   0xb   :  { %v94_v37 = vadd.f32 %v93_v28, %v27_v21  ;;  %v176_v41 = vmax.f32 %v175_v31, %v29_v36  ;;  %v211_v43 = vmax.f32 %v210_v25, %v62_v26  ;;  %v144_v56 = vadd.f32 %v143_v48, %v74_v34  ;;  %v77_v62 = vld [vmem:[%s586_s0 + $0x1b0] sm:$0xff]  ;;  %v416_v4 = vld [vmem:[%s586_s0 + $0x158] sm:$0xff]  ;;  %v32_v5 = vld [vmem:[%s586_s0 + $0x48] sm:$0xff] }
   0xc   :  { %v130_v30 = vadd.f32 %v129_v23, %v61_v20  ;;  %v226_v55 = vmax.f32 %v225_v47, %v76_v53  ;;  %v108_v63 = vadd.f32 %v40_v58, %v39_v57  ;;  %v189_v2 = vmax.f32 %v39_v57, %v40_v58  ;;  %v42_v9 = vld [vmem:[%s586_s0 + $0x98] sm:$0xff]  ;;  %v430_v17 = vld [vmem:[%s586_s0 + $0x160] sm:$0xff]  ;;  %v33_v23 = vld [vmem:[%s586_s0 + $0x50] sm:$0xff] }
   0xd   :  { %v95_v46 = vadd.f32 %v94_v37, %v28_v27  ;;  %v177_v51 = vmax.f32 %v176_v41, %v30_v45  ;;  %v212_v3 = vmax.f32 %v211_v43, %v63_v35  ;;  %v145_v8 = vadd.f32 %v144_v56, %v75_v42  ;;  %v78_v14 = vld [vmem:[%s586_s0 + $0x1b8] sm:$0xff]  ;;  %v43_v21 = vld [vmem:[%s586_s0 + $0xa0] sm:$0xff]  ;;  %v446_v28 = vld [vmem:[%s586_s0 + $0x168] sm:$0xff] }
   0xe   :  { %v131_v40 = vadd.f32 %v130_v30, %v62_v26  ;;  %v227_v7 = vmax.f32 %v226_v55, %v77_v62  ;;  %v109_v15 = vadd.f32 %v108_v63, %v41_v59  ;;  %v190_v16 = vmax.f32 %v189_v2, %v41_v59  ;;  %v79_v24 = vld [vmem:[%s586_s0 + $0x1c0] sm:$0xff]  ;;  %v44_v34 = vld [vmem:[%s586_s0 + $0xa8] sm:$0xff]  ;;  %v34_v37 = vld [vmem:[%s586_s0 + $0x58] sm:$0xff] }
   0xf   :  { %v96_v54 = vadd.f32 %v95_v46, %v29_v36  ;;  %v178_v61 = vmax.f32 %v177_v51, %v31_v52  ;;  %v146_v20 = vadd.f32 %v145_v8, %v76_v53  ;;  %v213_v27 = vmax.f32 %v212_v3, %v386_v44  ;;  %v80_v38 = vld [vmem:[%s586_s0 + $0x1c8] sm:$0xff]  ;;  %v461_v41 = vld [vmem:[%s586_s0 + $0x170] sm:$0xff]  ;;  %v35_v47 = vld [vmem:[%s586_s0 + $0x60] sm:$0xff] }
  0x10   :  { %v132_v50 = vadd.f32 %v131_v40, %v63_v35  ;;  %v228_v19 = vmax.f32 %v227_v7, %v78_v14  ;;  %v110_v25 = vadd.f32 %v109_v15, %v42_v9  ;;  %v191_v26 = vmax.f32 %v190_v16, %v42_v9  ;;  %v81_v48 = vld [vmem:[%s586_s0 + $0x1d0] sm:$0xff]  ;;  %v476_v53 = vld [vmem:[%s586_s0 + $0x178] sm:$0xff]  ;;  %v48_v16 = vld [vmem:[%s586_s0 + $0xc8] sm:$0xff] }
  0x11   :  { %v97_v6 = vadd.f32 %v96_v54, %v30_v45  ;;  %v179_v11 = vmax.f32 %v178_v61, %v32_v5  ;;  %v147_v33 = vadd.f32 %v146_v20, %v77_v62  ;;  %v45_v45 = vld [vmem:[%s586_s0 + $0xb0] sm:$0xff]  ;;  %v46_v57 = vld [vmem:[%s586_s0 + $0xb8] sm:$0xff] }
  0x12   :  { %v133_v60 = vadd.f32 %v132_v50, %v386_v44  ;;  %v229_v31 = vmax.f32 %v228_v19, %v79_v24  ;;  %v111_v39 = vadd.f32 %v110_v25, %v43_v21  ;;  %v192_v40 = vmax.f32 %v191_v26, %v43_v21  ;;  %v37_v7 = vld [vmem:[%s586_s0 + $0x70] sm:$0xff]  ;;  %v38_v19 = vld [vmem:[%s586_s0 + $0x78] sm:$0xff]  ;;  %v84_v25 = vld [vmem:[%s586_s0 + $0x1e8] sm:$0xff] }
  0x13   :  { %v98_v18 = vadd.f32 %v97_v6, %v31_v52  ;;  %v180_v36 = vmax.f32 %v179_v11, %v33_v23  ;;  %v148_v44 = vadd.f32 %v147_v33, %v78_v14  ;;  %v214_v52 = vmax.f32 %v213_v27, %v65_v49  ;;  %v83_v14 = vld [vmem:[%s586_s0 + $0x1e0] sm:$0xff] }
  0x14   :  { %v134_v10 = vadd.f32 %v133_v60, %v65_v49  ;;  %v230_v43 = vmax.f32 %v229_v31, %v80_v38  ;;  %v112_v50 = vadd.f32 %v111_v39, %v44_v34  ;;  %v193_v51 = vmax.f32 %v192_v40, %v44_v34  ;;  %v36_v60 = vld [vmem:[%s586_s0 + $0x68] sm:$0xff]  ;;  %v82_v49 = vld [vmem:[%s586_s0 + $0x1d8] sm:$0xff] }
  0x15   :  { %v99_v30 = vadd.f32 %v98_v18, %v32_v5  ;;  %v149_v56 = vadd.f32 %v148_v44, %v79_v24  ;;  %v181_v59 = vmax.f32 %v180_v36, %v34_v37  ;;  %v47_v5 = vld [vmem:[%s586_s0 + $0xc0] sm:$0xff]  ;;  %v49_v24 = vld [vmem:[%s586_s0 + $0xd0] sm:$0xff]  ;;  %v50_v34 = vld [vmem:[%s586_s0 + $0xd8] sm:$0xff] }
  0x16   :  { %v135_v22 = vadd.f32 %v134_v10, %v416_v4  ;;  %v231_v55 = vmax.f32 %v230_v43, %v81_v48  ;;  %v113_v61 = vadd.f32 %v112_v50, %v45_v45  ;;  %v194_v62 = vmax.f32 %v193_v51, %v45_v45 }
  0x17   :  { %v100_v42 = vadd.f32 %v99_v30, %v33_v23  ;;  %v150_v3 = vadd.f32 %v149_v56, %v80_v38  ;;  %v215_v10 = vmax.f32 %v214_v52, %v416_v4  ;;  %v182_v18 = vmax.f32 %v181_v59, %v35_v47 }
  0x18   :  { %v136_v35 = vadd.f32 %v135_v22, %v430_v17  ;;  %v232_v2 = vmax.f32 %v231_v55, %v82_v49  ;;  %v114_v8 = vadd.f32 %v113_v61, %v46_v57  ;;  %v195_v9 = vmax.f32 %v194_v62, %v46_v57  ;;  %v53_v55 = vld [vmem:[%s586_s0 + $0xf0] sm:$0xff] }
  0x19   :  { %v101_v54 = vadd.f32 %v100_v42, %v34_v37  ;;  %v151_v15 = vadd.f32 %v150_v3, %v81_v48  ;;  %v216_v30 = vmax.f32 %v215_v10, %v430_v17  ;;  %v85_v37 = vld [vmem:[%s586_s0 + $0x1f0] sm:$0xff]  ;;  %v51_v17 = vld [vmem:[%s586_s0 + $0xe0] sm:$0xff]  ;;  %v86_v42 = vld [vmem:[%s586_s0 + $0x1f8] sm:$0xff]  ;;  %v172_v59 = vmax.f32 %v329_v12, %v334_v13 }
  0x1a   :  { %v137_v46 = vadd.f32 %v136_v35, %v446_v28  ;;  %v233_v20 = vmax.f32 %v232_v2, %v83_v14  ;;  %v115_v21 = vadd.f32 %v114_v8, %v47_v5  ;;  %v196_v22 = vmax.f32 %v195_v9, %v47_v5  ;;  %v90_v9 = vld [vmem:[#allocation2 + $0x18] sm:$0xff] }
  0x1b   :  { %v102_v63 = vadd.f32 %v101_v54, %v35_v47  ;;  %v152_v23 = vadd.f32 %v151_v15, %v82_v49  ;;  %v183_v35 = vmax.f32 %v182_v18, %v36_v60  ;;  %v217_v45 = vmax.f32 %v216_v30, %v446_v28  ;;  %v52_v47 = vld [vmem:[%s586_s0 + $0xe8] sm:$0xff]  ;;  %v54_v28 = vld [vmem:[%s586_s0 + $0xf8] sm:$0xff] }
  0x1c   :  { %v138_v58 = vadd.f32 %v137_v46, %v461_v41  ;;  %v116_v26 = vadd.f32 %v115_v21, %v48_v16  ;;  %v197_v27 = vmax.f32 %v196_v22, %v48_v16  ;;  %v234_v36 = vmax.f32 %v233_v20, %v84_v25  ;;  %v88_v16 = vld [vmem:[#allocation2 + $0x8] sm:$0xff] }
  0x1d   :  { %v103_v11 = vadd.f32 %v102_v63, %v36_v60  ;;  %v153_v33 = vadd.f32 %v152_v23, %v83_v14  ;;  %v184_v48 = vmax.f32 %v183_v35, %v37_v7  ;;  %v223_v60 = vmax.f32 %v359_v29, %v364_v32  ;;  %v87_v32 = vld [vmem:[#allocation2] sm:$0xff] }
  0x1e   :  { %v139_v6 = vadd.f32 %v138_v58, %v476_v53  ;;  %v117_v38 = vadd.f32 %v116_v26, %v49_v24  ;;  %v198_v39 = vmax.f32 %v197_v27, %v49_v24  ;;  %v235_v50 = vmax.f32 %v234_v36, %v85_v37 }
  0x1f   :  { %v104_v4 = vadd.f32 %v103_v11, %v37_v7  ;;  %v154_v40 = vadd.f32 %v153_v33, %v84_v25  ;;  %v218_v58 = vmax.f32 %v217_v45, %v461_v41  ;;  %v185_v49 = vmax.f32 %v184_v48, %v38_v19 }
  0x20   :  { %140 = vadd.xlane.f32.xlu1 %v139_v6  ;;  %v118_v43 = vadd.f32 %v117_v38, %v50_v34  ;;  %v199_v44 = vmax.f32 %v198_v39, %v50_v34  ;;  %v236_v61 = vmax.f32 %v235_v50, %v86_v42  ;;  %v206_v41 = vmax.f32 %v301_v0, %v306_v1  ;;  %v89_v0 = vld [vmem:[#allocation2 + $0x10] sm:$0xff] }
  0x21   :  { %v105_v31 = vadd.f32 %v104_v4, %v38_v19  ;;  %v155_v46 = vadd.f32 %v154_v40, %v85_v37  ;;  %v219_v5 = vmax.f32 %v218_v58, %v476_v53  ;;  %v186_v6 = vmax.f32 %v185_v49, %v172_v59 }
  0x22   :  { %v119_v51 = vadd.f32 %v118_v43, %v51_v17  ;;  %v200_v52 = vmax.f32 %v199_v44, %v51_v17  ;;  %v237_v7 = vmax.f32 %v236_v61, %v223_v60  ;;  %v282_v13 = vmov -inf  }
  0x23   :  { %106 = vadd.xlane.f32.xlu0 %v105_v31  ;;  %v156_v54 = vadd.f32 %v155_v46, %v86_v42  ;;  %v220_v12 = vmax.f32 %v219_v5, %v206_v41  ;;  %20 = vst.msk [vmem:[#allocation3 + $0x8] sm:$0xff] %vm14_vm0, %v282_v13  ;;  %19 = vst.msk [vmem:[#allocation3] sm:$0xff] %vm14_vm0, %v282_v13 }
  0x24   :  { %v120_v56 = vadd.f32 %v119_v51, %v52_v47  ;;  %v201_v57 = vmax.f32 %v200_v52, %v52_v47  ;;  %21 = vst.msk [vmem:[#allocation3 + $0x10] sm:$0xff] %vm14_vm0, %v282_v13  ;;  %22 = vst.msk [vmem:[#allocation3 + $0x18] sm:$0xff] %vm14_vm0, %v282_v13 }
  0x25   :  { %157 = vadd.xlane.f32.xlu1 %v156_v54 }
  0x26   :  { %v121_v62 = vadd.f32 %v120_v56, %v53_v55  ;;  %v202_v63 = vmax.f32 %v201_v57, %v53_v55 }
  0x28   :  { %v122_v2 = vadd.f32 %v121_v62, %v54_v28  ;;  %v203_v3 = vmax.f32 %v202_v63, %v54_v28 }
  0x2a   :  { %123 = vadd.xlane.f32.xlu0 %v122_v2  ;;  %204 = vmax.xlane.f32.xlu1 %v203_v3  ;;  %v169_v18 = vld [vmem:[#allocation3 + $0x8] sm:$0xff]  ;;  %v168_v24 = vld [vmem:[#allocation3] sm:$0xff] }
  0x2b   :  { %v171_v25 = vld [vmem:[#allocation3 + $0x18] sm:$0xff]  ;;  %v170_v35 = vld [vmem:[#allocation3 + $0x10] sm:$0xff] }
  0x2e   :  { %187 = vmax.xlane.f32.xlu0 %v186_v6  ;;  %238 = vmax.xlane.f32.xlu1 %v237_v7 }
  0x32   :  { %221 = vmax.xlane.f32.xlu0 %v220_v12 }
  0xad   :  { %v141_v1 = vpop.xlane.xlu1 %140 }
  0xae   :  { %v161_v29 = vadd.f32 %v141_v1, %v89_v0 }
  0xb0   :  { %166 = vst.msk [vmem:[#allocation2 + $0x10] sm:$0xff] %vm14_vm0, %v161_v29  ;;  %v107_v53 = vpop.xlane.xlu0 %106 }
  0xb1   :  { %v159_v8 = vadd.f32 %v107_v53, %v87_v32 }
  0xb2   :  { %v158_v14 = vpop.xlane.xlu1 %157 }
  0xb3   :  { %164 = vst.msk [vmem:[#allocation2] sm:$0xff] %vm14_vm0, %v159_v8  ;;  %v162_v15 = vadd.f32 %v158_v14, %v90_v9 }
  0xb5   :  { %167 = vst.msk [vmem:[#allocation2 + $0x18] sm:$0xff] %vm14_vm0, %v162_v15 }
  0xb7   :  { %v253_v10 = vld [vmem:[#allocation2 + $0x10] sm:$0xff]  ;;  %v124_v21 = vpop.xlane.xlu0 %123  ;;  %v205_v22 = vpop.xlane.xlu1 %204 }
  0xb8   :  { %v257_v11 = vmul.f32 0.00048828125, %v253_v10  ;;  %v160_v4 = vadd.f32 %v124_v21, %v88_v16  ;;  %v241_v23 = vmax.f32 %v169_v18, %v205_v22 }
  0xba   :  { %261 = vst.msk [vmem:[%s587_s1 + $0x10] sm:$0xff] %vm14_vm0, %v257_v11  ;;  %v251_v19 = vld [vmem:[#allocation2] sm:$0xff]  ;;  %165 = vst.msk [vmem:[#allocation2 + $0x8] sm:$0xff] %vm14_vm0, %v160_v4 }
  0xbb   :  { %v255_v20 = vmul.f32 0.00048828125, %v251_v19  ;;  %245 = vst.msk [vmem:[#allocation3 + $0x8] sm:$0xff] %vm14_vm0, %v241_v23  ;;  %v188_v26 = vpop.xlane.xlu0 %187  ;;  %v239_v27 = vpop.xlane.xlu1 %238 }
  0xbc   :  { %v254_v30 = vld [vmem:[#allocation2 + $0x18] sm:$0xff]  ;;  %v240_v31 = vmax.f32 %v168_v24, %v188_v26  ;;  %v243_v33 = vmax.f32 %v171_v25, %v239_v27 }
  0xbd   :  { %259 = vst.msk [vmem:[%s587_s1] sm:$0xff] %vm14_vm0, %v255_v20  ;;  %v258_v34 = vmul.f32 0.00048828125, %v254_v30 }
  0xbe   :  { %244 = vst.msk [vmem:[#allocation3] sm:$0xff] %vm14_vm0, %v240_v31  ;;  %247 = vst.msk [vmem:[#allocation3 + $0x18] sm:$0xff] %vm14_vm0, %v243_v33 }
  0xbf   :  { %262 = vst.msk [vmem:[%s587_s1 + $0x18] sm:$0xff] %vm14_vm0, %v258_v34  ;;  %v222_v36 = vpop.xlane.xlu0 %221 }
  0xc0   :  { %v242_v37 = vmax.f32 %v170_v35, %v222_v36 }
  0xc1   :  { %v252_v38 = vld [vmem:[#allocation2 + $0x8] sm:$0xff] }
  0xc2   :  { %v264_v39 = vld [vmem:[#allocation3 + $0x8] sm:$0xff]  ;;  %v256_v40 = vmul.f32 0.00048828125, %v252_v38  ;;  %246 = vst.msk [vmem:[#allocation3 + $0x10] sm:$0xff] %vm14_vm0, %v242_v37 }
  0xc3   :  { %268 = vst.msk [vmem:[%s588_s2 + $0x8] sm:$0xff] %vm14_vm0, %v264_v39 }
  0xc4   :  { %260 = vst.msk [vmem:[%s587_s1 + $0x8] sm:$0xff] %vm14_vm0, %v256_v40 }
  0xc5   :  { %v263_v17 = vld [vmem:[#allocation3] sm:$0xff]  ;;  %v266_v42 = vld [vmem:[#allocation3 + $0x18] sm:$0xff] }
  0xc6   :  { %267 = vst.msk [vmem:[%s588_s2] sm:$0xff] %vm14_vm0, %v263_v17  ;;  %270 = vst.msk [vmem:[%s588_s2 + $0x18] sm:$0xff] %vm14_vm0, %v266_v42 }
  0xc9   :  { %v265_v43 = vld [vmem:[#allocation3 + $0x10] sm:$0xff] }
  0xca   :  { %269 = vst.msk [vmem:[%s588_s2 + $0x10] sm:$0xff] %vm14_vm0, %v265_v43 }

// kernel: channel_attention_3d.3
= control target key start
LH: loop header
LB: loop body
LE: loop exit
PB: predicated region body
PF: predicated region fallthrough
CT: control target
= control target key end

     0   :  { %v234_v0 = vmov 0   ;;  %s682_s1 = inlined_call_operand.vmem [shape: f32[32,1], index: 1, kind: input, shape index: {}]   ;;  %s683_s0 = inlined_call_operand.vmem [shape: f32[32,2048], index: 0, kind: input, shape index: {}]   ;;  %s684_s2 = inlined_call_operand.vmem [shape: f32[32,2048], index: 2, kind: output, shape index: {}]  }
   0x1   :  { %233 = vset.pattern.permute.xlu1 %v234_v0  ;;  %232 = vset.pattern.permute.xlu0 %v234_v0  ;;  %v13_v1 = vld [vmem:[%s682_s1 + $0x10] sm:$0xff]  ;;  %v11_v2 = vld [vmem:[%s682_s1] sm:$0xff]  ;;  %v14_v3 = vld [vmem:[%s682_s1 + $0x18] sm:$0xff] }
   0x2   :  { %91 = vperm.xlu1 %233, %v13_v1   ;;  %81 = vperm.xlu0 %232, %v11_v2   ;;  %v12_v4 = vld [vmem:[%s682_s1 + $0x8] sm:$0xff]  ;;  %v47_v5 = vld [vmem:[%s683_s0 + $0x100] sm:$0xff]  ;;  %v49_v7 = vld [vmem:[%s683_s0 + $0x110] sm:$0xff] }
   0x3   :  { %v48_v6 = vld [vmem:[%s683_s0 + $0x108] sm:$0xff]  ;;  %v50_v8 = vld [vmem:[%s683_s0 + $0x118] sm:$0xff]  ;;  %v51_v9 = vld [vmem:[%s683_s0 + $0x120] sm:$0xff] }
   0x4   :  { %v52_v10 = vld [vmem:[%s683_s0 + $0x128] sm:$0xff]  ;;  %v53_v11 = vld [vmem:[%s683_s0 + $0x130] sm:$0xff]  ;;  %v54_v12 = vld [vmem:[%s683_s0 + $0x138] sm:$0xff] }
   0x5   :  { %v55_v13 = vld [vmem:[%s683_s0 + $0x140] sm:$0xff]  ;;  %v56_v14 = vld [vmem:[%s683_s0 + $0x148] sm:$0xff]  ;;  %v57_v15 = vld [vmem:[%s683_s0 + $0x150] sm:$0xff] }
   0x6   :  { %96 = vperm.xlu1 %233, %v14_v3   ;;  %86 = vperm.xlu0 %232, %v12_v4   ;;  %v58_v16 = vld [vmem:[%s683_s0 + $0x158] sm:$0xff]  ;;  %v59_v17 = vld [vmem:[%s683_s0 + $0x160] sm:$0xff]  ;;  %v60_v18 = vld [vmem:[%s683_s0 + $0x168] sm:$0xff] }
   0x7   :  { %v61_v19 = vld [vmem:[%s683_s0 + $0x170] sm:$0xff]  ;;  %v62_v20 = vld [vmem:[%s683_s0 + $0x178] sm:$0xff]  ;;  %v15_v22 = vld [vmem:[%s683_s0] sm:$0xff] }
   0x8   :  { %v16_v23 = vld [vmem:[%s683_s0 + $0x8] sm:$0xff]  ;;  %v17_v24 = vld [vmem:[%s683_s0 + $0x10] sm:$0xff]  ;;  %v18_v25 = vld [vmem:[%s683_s0 + $0x18] sm:$0xff] }
   0x9   :  { %v19_v30 = vld [vmem:[%s683_s0 + $0x20] sm:$0xff]  ;;  %v20_v31 = vld [vmem:[%s683_s0 + $0x28] sm:$0xff]  ;;  %v21_v32 = vld [vmem:[%s683_s0 + $0x30] sm:$0xff] }
   0xa   :  { %v22_v33 = vld [vmem:[%s683_s0 + $0x38] sm:$0xff]  ;;  %v23_v39 = vld [vmem:[%s683_s0 + $0x40] sm:$0xff]  ;;  %v24_v40 = vld [vmem:[%s683_s0 + $0x48] sm:$0xff] }
   0xb   :  { %v25_v41 = vld [vmem:[%s683_s0 + $0x50] sm:$0xff]  ;;  %v26_v42 = vld [vmem:[%s683_s0 + $0x58] sm:$0xff]  ;;  %v27_v47 = vld [vmem:[%s683_s0 + $0x60] sm:$0xff] }
   0xc   :  { %v28_v48 = vld [vmem:[%s683_s0 + $0x68] sm:$0xff]  ;;  %v29_v49 = vld [vmem:[%s683_s0 + $0x70] sm:$0xff]  ;;  %v30_v50 = vld [vmem:[%s683_s0 + $0x78] sm:$0xff] }
   0xd   :  { %v63_v55 = vld [vmem:[%s683_s0 + $0x180] sm:$0xff]  ;;  %v64_v56 = vld [vmem:[%s683_s0 + $0x188] sm:$0xff]  ;;  %v65_v57 = vld [vmem:[%s683_s0 + $0x190] sm:$0xff] }
   0xe   :  { %v66_v58 = vld [vmem:[%s683_s0 + $0x198] sm:$0xff]  ;;  %v67_v63 = vld [vmem:[%s683_s0 + $0x1a0] sm:$0xff]  ;;  %v68_v0 = vld [vmem:[%s683_s0 + $0x1a8] sm:$0xff] }
   0xf   :  { %v69_v1 = vld [vmem:[%s683_s0 + $0x1b0] sm:$0xff]  ;;  %v70_v2 = vld [vmem:[%s683_s0 + $0x1b8] sm:$0xff] }
  0x81   :  { %v92_v21 = vpop.permute.xlu1 %91  ;;  %v334_v38 = vpop.permute.xlu0 %81 }
  0x82   :  { %v131_v26 = vmul.f32 %v92_v21, %v47_v5  ;;  %v132_v27 = vmul.f32 %v92_v21, %v48_v6  ;;  %v133_v28 = vmul.f32 %v92_v21, %v49_v7  ;;  %v134_v29 = vmul.f32 %v92_v21, %v50_v8  ;;  %v71_v8 = vld [vmem:[%s683_s0 + $0x1c0] sm:$0xff] }
  0x83   :  { %v135_v34 = vmul.f32 %v92_v21, %v51_v9  ;;  %v136_v35 = vmul.f32 %v92_v21, %v52_v10  ;;  %v137_v36 = vmul.f32 %v92_v21, %v53_v11  ;;  %v138_v37 = vmul.f32 %v92_v21, %v54_v12  ;;  %v72_v9 = vld [vmem:[%s683_s0 + $0x1c8] sm:$0xff]  ;;  %v73_v10 = vld [vmem:[%s683_s0 + $0x1d0] sm:$0xff] }
  0x84   :  { %v139_v43 = vmul.f32 %v92_v21, %v55_v13  ;;  %v140_v44 = vmul.f32 %v92_v21, %v56_v14  ;;  %v141_v45 = vmul.f32 %v92_v21, %v57_v15  ;;  %v142_v46 = vmul.f32 %v92_v21, %v58_v16  ;;  %195 = vst [vmem:[%s684_s2 + $0x100] sm:$0xff] %v131_v26  ;;  %v74_v15 = vld [vmem:[%s683_s0 + $0x1d8] sm:$0xff]  ;;  %v75_v16 = vld [vmem:[%s683_s0 + $0x1e0] sm:$0xff] }
  0x85   :  { %196 = vst [vmem:[%s684_s2 + $0x108] sm:$0xff] %v132_v27  ;;  %197 = vst [vmem:[%s684_s2 + $0x110] sm:$0xff] %v133_v28  ;;  %v143_v51 = vmul.f32 %v92_v21, %v59_v17  ;;  %v144_v52 = vmul.f32 %v92_v21, %v60_v18  ;;  %v145_v53 = vmul.f32 %v92_v21, %v61_v19  ;;  %v440_v7 = vpop.permute.xlu1 %96  ;;  %v76_v17 = vld [vmem:[%s683_s0 + $0x1e8] sm:$0xff] }
  0x86   :  { %198 = vst [vmem:[%s684_s2 + $0x118] sm:$0xff] %v134_v29  ;;  %v146_v54 = vmul.f32 %v92_v21, %v62_v20  ;;  %199 = vst [vmem:[%s684_s2 + $0x120] sm:$0xff] %v135_v34  ;;  %v99_v59 = vmul.f32 %v334_v38, %v15_v22  ;;  %v100_v60 = vmul.f32 %v334_v38, %v16_v23  ;;  %v77_v22 = vld [vmem:[%s683_s0 + $0x1f0] sm:$0xff]  ;;  %v78_v23 = vld [vmem:[%s683_s0 + $0x1f8] sm:$0xff] }
  0x87   :  { %200 = vst [vmem:[%s684_s2 + $0x128] sm:$0xff] %v136_v35  ;;  %201 = vst [vmem:[%s684_s2 + $0x130] sm:$0xff] %v137_v36  ;;  %v101_v61 = vmul.f32 %v334_v38, %v17_v24  ;;  %v102_v62 = vmul.f32 %v334_v38, %v18_v25  ;;  %v103_v3 = vmul.f32 %v334_v38, %v19_v30  ;;  %v31_v24 = vld [vmem:[%s683_s0 + $0x80] sm:$0xff]  ;;  %v32_v29 = vld [vmem:[%s683_s0 + $0x88] sm:$0xff]  ;;  %v87_v36 = vpop.permute.xlu0 %86 }
  0x88   :  { %202 = vst [vmem:[%s684_s2 + $0x138] sm:$0xff] %v138_v37  ;;  %203 = vst [vmem:[%s684_s2 + $0x140] sm:$0xff] %v139_v43  ;;  %v104_v4 = vmul.f32 %v334_v38, %v20_v31  ;;  %v105_v5 = vmul.f32 %v334_v38, %v21_v32  ;;  %v106_v6 = vmul.f32 %v334_v38, %v22_v33  ;;  %v33_v30 = vld [vmem:[%s683_s0 + $0x90] sm:$0xff]  ;;  %v34_v31 = vld [vmem:[%s683_s0 + $0x98] sm:$0xff] }
  0x89   :  { %204 = vst [vmem:[%s684_s2 + $0x148] sm:$0xff] %v140_v44  ;;  %205 = vst [vmem:[%s684_s2 + $0x150] sm:$0xff] %v141_v45  ;;  %v107_v11 = vmul.f32 %v334_v38, %v23_v39  ;;  %v108_v12 = vmul.f32 %v334_v38, %v24_v40  ;;  %v109_v13 = vmul.f32 %v334_v38, %v25_v41  ;;  %v35_v37 = vld [vmem:[%s683_s0 + $0xa0] sm:$0xff]  ;;  %v37_v39 = vld [vmem:[%s683_s0 + $0xb0] sm:$0xff] }
  0x8a   :  { %206 = vst [vmem:[%s684_s2 + $0x158] sm:$0xff] %v142_v46  ;;  %207 = vst [vmem:[%s684_s2 + $0x160] sm:$0xff] %v143_v51  ;;  %v110_v14 = vmul.f32 %v334_v38, %v26_v42  ;;  %v111_v18 = vmul.f32 %v334_v38, %v27_v47  ;;  %v112_v19 = vmul.f32 %v334_v38, %v28_v48  ;;  %v38_v44 = vld [vmem:[%s683_s0 + $0xb8] sm:$0xff]  ;;  %v39_v45 = vld [vmem:[%s683_s0 + $0xc0] sm:$0xff] }
  0x8b   :  { %208 = vst [vmem:[%s684_s2 + $0x168] sm:$0xff] %v144_v52  ;;  %209 = vst [vmem:[%s684_s2 + $0x170] sm:$0xff] %v145_v53  ;;  %v113_v20 = vmul.f32 %v334_v38, %v29_v49  ;;  %v114_v21 = vmul.f32 %v334_v38, %v30_v50  ;;  %v147_v25 = vmul.f32 %v440_v7, %v63_v55  ;;  %v36_v38 = vld [vmem:[%s683_s0 + $0xa8] sm:$0xff]  ;;  %v41_v51 = vld [vmem:[%s683_s0 + $0xd0] sm:$0xff] }
  0x8c   :  { %210 = vst [vmem:[%s684_s2 + $0x178] sm:$0xff] %v146_v54  ;;  %163 = vst [vmem:[%s684_s2] sm:$0xff] %v99_v59  ;;  %v148_v26 = vmul.f32 %v440_v7, %v64_v56  ;;  %v149_v27 = vmul.f32 %v440_v7, %v65_v57  ;;  %v150_v28 = vmul.f32 %v440_v7, %v66_v58  ;;  %v40_v46 = vld [vmem:[%s683_s0 + $0xc8] sm:$0xff]  ;;  %v42_v52 = vld [vmem:[%s683_s0 + $0xd8] sm:$0xff] }
  0x8d   :  { %164 = vst [vmem:[%s684_s2 + $0x8] sm:$0xff] %v100_v60  ;;  %165 = vst [vmem:[%s684_s2 + $0x10] sm:$0xff] %v101_v61  ;;  %v151_v32 = vmul.f32 %v440_v7, %v67_v63  ;;  %v152_v33 = vmul.f32 %v440_v7, %v68_v0  ;;  %v153_v34 = vmul.f32 %v440_v7, %v69_v1  ;;  %v43_v53 = vld [vmem:[%s683_s0 + $0xe0] sm:$0xff]  ;;  %v44_v54 = vld [vmem:[%s683_s0 + $0xe8] sm:$0xff] }
  0x8e   :  { %166 = vst [vmem:[%s684_s2 + $0x18] sm:$0xff] %v102_v62  ;;  %167 = vst [vmem:[%s684_s2 + $0x20] sm:$0xff] %v103_v3  ;;  %v154_v35 = vmul.f32 %v440_v7, %v70_v2  ;;  %v155_v40 = vmul.f32 %v440_v7, %v71_v8  ;;  %v156_v41 = vmul.f32 %v440_v7, %v72_v9  ;;  %v45_v55 = vld [vmem:[%s683_s0 + $0xf0] sm:$0xff]  ;;  %v46_v56 = vld [vmem:[%s683_s0 + $0xf8] sm:$0xff] }
  0x8f   :  { %168 = vst [vmem:[%s684_s2 + $0x28] sm:$0xff] %v104_v4  ;;  %169 = vst [vmem:[%s684_s2 + $0x30] sm:$0xff] %v105_v5  ;;  %v157_v42 = vmul.f32 %v440_v7, %v73_v10  ;;  %v158_v43 = vmul.f32 %v440_v7, %v74_v15  ;;  %v159_v47 = vmul.f32 %v440_v7, %v75_v16 }
  0x90   :  { %170 = vst [vmem:[%s684_s2 + $0x38] sm:$0xff] %v106_v6  ;;  %171 = vst [vmem:[%s684_s2 + $0x40] sm:$0xff] %v107_v11  ;;  %v160_v48 = vmul.f32 %v440_v7, %v76_v17  ;;  %v161_v49 = vmul.f32 %v440_v7, %v77_v22  ;;  %v162_v50 = vmul.f32 %v440_v7, %v78_v23 }
  0x91   :  { %172 = vst [vmem:[%s684_s2 + $0x48] sm:$0xff] %v108_v12  ;;  %173 = vst [vmem:[%s684_s2 + $0x50] sm:$0xff] %v109_v13  ;;  %v115_v57 = vmul.f32 %v87_v36, %v31_v24  ;;  %v116_v58 = vmul.f32 %v87_v36, %v32_v29  ;;  %v117_v59 = vmul.f32 %v87_v36, %v33_v30 }
  0x92   :  { %174 = vst [vmem:[%s684_s2 + $0x58] sm:$0xff] %v110_v14  ;;  %175 = vst [vmem:[%s684_s2 + $0x60] sm:$0xff] %v111_v18  ;;  %v118_v60 = vmul.f32 %v87_v36, %v34_v31  ;;  %v119_v61 = vmul.f32 %v87_v36, %v35_v37  ;;  %v120_v62 = vmul.f32 %v87_v36, %v36_v38 }
  0x93   :  { %176 = vst [vmem:[%s684_s2 + $0x68] sm:$0xff] %v112_v19  ;;  %177 = vst [vmem:[%s684_s2 + $0x70] sm:$0xff] %v113_v20  ;;  %v121_v63 = vmul.f32 %v87_v36, %v37_v39  ;;  %v122_v0 = vmul.f32 %v87_v36, %v38_v44  ;;  %v123_v1 = vmul.f32 %v87_v36, %v39_v45 }
  0x94   :  { %178 = vst [vmem:[%s684_s2 + $0x78] sm:$0xff] %v114_v21  ;;  %211 = vst [vmem:[%s684_s2 + $0x180] sm:$0xff] %v147_v25  ;;  %v124_v2 = vmul.f32 %v87_v36, %v40_v46  ;;  %v125_v3 = vmul.f32 %v87_v36, %v41_v51  ;;  %v126_v4 = vmul.f32 %v87_v36, %v42_v52 }
  0x95   :  { %212 = vst [vmem:[%s684_s2 + $0x188] sm:$0xff] %v148_v26  ;;  %213 = vst [vmem:[%s684_s2 + $0x190] sm:$0xff] %v149_v27  ;;  %v127_v5 = vmul.f32 %v87_v36, %v43_v53  ;;  %v128_v6 = vmul.f32 %v87_v36, %v44_v54  ;;  %v129_v7 = vmul.f32 %v87_v36, %v45_v55 }
  0x96   :  { %214 = vst [vmem:[%s684_s2 + $0x198] sm:$0xff] %v150_v28  ;;  %215 = vst [vmem:[%s684_s2 + $0x1a0] sm:$0xff] %v151_v32  ;;  %v130_v8 = vmul.f32 %v87_v36, %v46_v56 }
  0x97   :  { %216 = vst [vmem:[%s684_s2 + $0x1a8] sm:$0xff] %v152_v33  ;;  %217 = vst [vmem:[%s684_s2 + $0x1b0] sm:$0xff] %v153_v34 }
  0x98   :  { %218 = vst [vmem:[%s684_s2 + $0x1b8] sm:$0xff] %v154_v35  ;;  %219 = vst [vmem:[%s684_s2 + $0x1c0] sm:$0xff] %v155_v40 }
  0x99   :  { %220 = vst [vmem:[%s684_s2 + $0x1c8] sm:$0xff] %v156_v41  ;;  %221 = vst [vmem:[%s684_s2 + $0x1d0] sm:$0xff] %v157_v42 }
  0x9a   :  { %222 = vst [vmem:[%s684_s2 + $0x1d8] sm:$0xff] %v158_v43  ;;  %223 = vst [vmem:[%s684_s2 + $0x1e0] sm:$0xff] %v159_v47 }
  0x9b   :  { %224 = vst [vmem:[%s684_s2 + $0x1e8] sm:$0xff] %v160_v48  ;;  %225 = vst [vmem:[%s684_s2 + $0x1f0] sm:$0xff] %v161_v49 }
  0x9c   :  { %226 = vst [vmem:[%s684_s2 + $0x1f8] sm:$0xff] %v162_v50  ;;  %179 = vst [vmem:[%s684_s2 + $0x80] sm:$0xff] %v115_v57 }
  0x9d   :  { %180 = vst [vmem:[%s684_s2 + $0x88] sm:$0xff] %v116_v58  ;;  %181 = vst [vmem:[%s684_s2 + $0x90] sm:$0xff] %v117_v59 }
  0x9e   :  { %182 = vst [vmem:[%s684_s2 + $0x98] sm:$0xff] %v118_v60  ;;  %183 = vst [vmem:[%s684_s2 + $0xa0] sm:$0xff] %v119_v61 }
  0x9f   :  { %184 = vst [vmem:[%s684_s2 + $0xa8] sm:$0xff] %v120_v62  ;;  %185 = vst [vmem:[%s684_s2 + $0xb0] sm:$0xff] %v121_v63 }
  0xa0   :  { %186 = vst [vmem:[%s684_s2 + $0xb8] sm:$0xff] %v122_v0  ;;  %187 = vst [vmem:[%s684_s2 + $0xc0] sm:$0xff] %v123_v1 }
  0xa1   :  { %188 = vst [vmem:[%s684_s2 + $0xc8] sm:$0xff] %v124_v2  ;;  %189 = vst [vmem:[%s684_s2 + $0xd0] sm:$0xff] %v125_v3 }
  0xa2   :  { %190 = vst [vmem:[%s684_s2 + $0xd8] sm:$0xff] %v126_v4  ;;  %191 = vst [vmem:[%s684_s2 + $0xe0] sm:$0xff] %v127_v5 }
  0xa3   :  { %192 = vst [vmem:[%s684_s2 + $0xe8] sm:$0xff] %v128_v6  ;;  %193 = vst [vmem:[%s684_s2 + $0xf0] sm:$0xff] %v129_v7 }
  0xa4   :  { %194 = vst [vmem:[%s684_s2 + $0xf8] sm:$0xff] %v130_v8 }

</bundles_post_ra>
